<compile_context>
chip_gen: v7x
topology: tpu7x:2x2x1
jax: 0.10.0
libtpu: 0.0.40
codegen_flags: <defaults>
</compile_context>

<pallas_src>
import functools

import jax
import jax.numpy as jnp
from jax.experimental import pallas as pl
from jax.experimental.pallas import tpu as pltpu


def _round_up(n, m):
    return ((n + m - 1) // m) * m


def mlp_kernel(x_ref, w1_ref, b1_ref, w2_ref, b2_ref, w3_ref, b3_ref, o_ref):
    x = x_ref[...]                       # (TB, K_in)
    k_in = x.shape[-1]

    # ---- Layer 1: Linear + ReLU -------------------------------------------
    if k_in <= 8:
        # Tiny contraction dim: do it on the VPU (broadcast rows of w1),
        # freeing the MXU / vex slot instead of wasting a systolic pass.
        h1 = x[:, 0:1] * w1_ref[0:1, :]
        for k in range(1, k_in):
            h1 = h1 + x[:, k:k + 1] * w1_ref[k:k + 1, :]
    else:
        h1 = jnp.dot(x, w1_ref[...], preferred_element_type=jnp.float32)
    h1 = jnp.maximum(h1 + b1_ref[...], 0.0)          # (TB, H1p)

    # ---- Layer 2: Linear + ReLU -------------------------------------------
    h2 = jnp.dot(h1, w2_ref[...], preferred_element_type=jnp.float32)
    h2 = jnp.maximum(h2 + b2_ref[...], 0.0)          # (TB, H2p)

    # ---- Layer 3: Linear (no activation) ----------------------------------
    out = jnp.dot(h2, w3_ref[...], preferred_element_type=jnp.float32)
    o_ref[...] = (out + b3_ref[...]).astype(o_ref.dtype)


@functools.partial(jax.jit, static_argnames=("block_b",))
def mlp_forward(x, params, *, block_b=512):
    """x: [B, ...] float32 (flattened to [B, input_size]).
    params: dict of w1,b1,w2,b2,w3,b3 with weights stored [in, out]."""
    B = x.shape[0]
    x2d = x.reshape(B, -1).astype(jnp.float32)
    k_in = x2d.shape[1]

    w1, b1 = params["w1"], params["b1"]
    w2, b2 = params["w2"], params["b2"]
    w3, b3 = params["w3"], params["b3"]

    H1, H2, OUT = w1.shape[1], w2.shape[1], w3.shape[1]
    H1p, H2p, OUTp = (_round_up(d, 128) for d in (H1, H2, OUT))

    # Zero-pad weights/biases so every layer is lane-dense (last dim % 128 == 0).
    def pad2(a, rows, cols):
        return jnp.pad(a, ((0, rows - a.shape[0]), (0, cols - a.shape[1])))

    w1p = pad2(w1, k_in, H1p)
    b1p = pad2(b1, 1, H1p)
    w2p = pad2(w2, H1p, H2p)
    b2p = pad2(b2, 1, H2p)
    w3p = pad2(w3, H2p, OUTp)
    b3p = pad2(b3, 1, OUTp)

    # Batch tiling: pad B to a multiple of 8, cap the tile, pad B to a
    # multiple of the tile so every grid step sees a full block.
    Bp = _round_up(B, 8)
    TB = min(block_b, Bp)
    Bp = _round_up(Bp, TB)
    xp = jnp.pad(x2d, ((0, Bp - B), (0, 0)))

    n_blocks = Bp // TB

    weight_spec = lambda shape: pl.BlockSpec(shape, lambda i: (0, 0))

    flops = 2 * Bp * (k_in * H1p + H1p * H2p + H2p * OUTp)
    bytes_accessed = 4 * (
        Bp * k_in + Bp * OUTp
        + k_in * H1p + H1p * H2p + H2p * OUTp + H1p + H2p + OUTp
    )

    out_padded = pl.pallas_call(
        mlp_kernel,
        out_shape=jax.ShapeDtypeStruct((Bp, OUTp), jnp.float32),
        grid=(n_blocks,),
        in_specs=[
            pl.BlockSpec((TB, k_in), lambda i: (i, 0)),   # activations stream
            weight_spec(w1p.shape), weight_spec(b1p.shape),  # weights resident
            weight_spec(w2p.shape), weight_spec(b2p.shape),
            weight_spec(w3p.shape), weight_spec(b3p.shape),
        ],
        out_specs=pl.BlockSpec((TB, OUTp), lambda i: (i, 0)),
        compiler_params=pltpu.CompilerParams(
            dimension_semantics=("parallel",)),
        cost_estimate=pl.CostEstimate(
            flops=flops, transcendentals=0, bytes_accessed=bytes_accessed),
    )(xp, w1p, b1p, w2p, b2p, w3p, b3p)

    # Slice back to the true batch and output width.
    return out_padded[:B, :OUT]


def init_params(key, input_size=2, layer_sizes=(100, 50, 10)):
    """Deterministic init mimicking nn.Linear's uniform(-1/sqrt(fan_in), ...).
    Weights stored as [in, out] (transposed vs PyTorch's [out, in])."""
    sizes = [input_size] + list(layer_sizes)
    params = {}
    for i in range(3):
        fan_in, fan_out = sizes[i], sizes[i + 1]
        key, kw, kb = jax.random.split(key, 3)
        bound = 1.0 / jnp.sqrt(jnp.float32(fan_in))
        params[f"w{i+1}"] = jax.random.uniform(
            kw, (fan_in, fan_out), jnp.float32, -bound, bound)
        params[f"b{i+1}"] = jax.random.uniform(
            kb, (1, fan_out), jnp.float32, -bound, bound)
    return params


if __name__ == "__main__":
    key = jax.random.PRNGKey(0)
    kx, kp = jax.random.split(key)

    B, INPUT_SIZE = 8, 2
    x = jax.random.normal(kx, (B, INPUT_SIZE), jnp.float32)
    params = init_params(kp, input_size=INPUT_SIZE, layer_sizes=(100, 50, 10))

    out = mlp_forward(x, params)
    out = jax.block_until_ready(out)

    # Reference check in plain JAX (same math, unpadded).
    h = jnp.maximum(x @ params["w1"] + params["b1"], 0.0)
    h = jnp.maximum(h @ params["w2"] + params["b2"], 0.0)
    ref = h @ params["w3"] + params["b3"]

    assert out.shape == (B, 10), out.shape
    assert jnp.allclose(out, ref, atol=1e-4, rtol=1e-4), \
        float(jnp.max(jnp.abs(out - ref)))

    print("KERNEL_OK")
</pallas_src>

<mosaic_0001>
module attributes {stable_mosaic.version = 11 : i64} {
  func.func @mlp_kernel(%arg0: i32, %arg1: memref<8x2xf32, #tpu.memory_space<vmem>>, %arg2: memref<2x128xf32, #tpu.memory_space<vmem>>, %arg3: memref<1x128xf32, #tpu.memory_space<vmem>>, %arg4: memref<128x128xf32, #tpu.memory_space<vmem>>, %arg5: memref<1x128xf32, #tpu.memory_space<vmem>>, %arg6: memref<128x128xf32, #tpu.memory_space<vmem>>, %arg7: memref<1x128xf32, #tpu.memory_space<vmem>>, %arg8: memref<8x128xf32, #tpu.memory_space<vmem>>) attributes {dimension_semantics = [#tpu.dimension_semantics<parallel>], iteration_bounds = array<i64: 1>, scalar_prefetch = 0 : i64, scratch_operands = 0 : i64, tpu.core_type = #tpu.core_type<tc>, window_params = [{transform_indices = @transform_0, window_bounds = array<i64: 8, 2>}, {pipeline_mode = #tpu.pipeline_mode<synchronous>, transform_indices = @transform_1, window_bounds = array<i64: 2, 128>}, {pipeline_mode = #tpu.pipeline_mode<synchronous>, transform_indices = @transform_2, window_bounds = array<i64: 1, 128>}, {pipeline_mode = #tpu.pipeline_mode<synchronous>, transform_indices = @transform_3, window_bounds = array<i64: 128, 128>}, {pipeline_mode = #tpu.pipeline_mode<synchronous>, transform_indices = @transform_4, window_bounds = array<i64: 1, 128>}, {pipeline_mode = #tpu.pipeline_mode<synchronous>, transform_indices = @transform_5, window_bounds = array<i64: 128, 128>}, {pipeline_mode = #tpu.pipeline_mode<synchronous>, transform_indices = @transform_6, window_bounds = array<i64: 1, 128>}, {transform_indices = @transform_7, window_bounds = array<i64: 8, 128>}]} {
    %c0 = arith.constant 0 : index
    %c0_0 = arith.constant 0 : index
    %0 = vector.load %arg1[%c0, %c0_0] : memref<8x2xf32, #tpu.memory_space<vmem>>, vector<8x2xf32>
    %1 = vector.extract_strided_slice %0 {offsets = [0, 0], sizes = [8, 1], strides = [1, 1]} : vector<8x2xf32> to vector<8x1xf32>
    %c0_1 = arith.constant 0 : index
    %c0_2 = arith.constant 0 : index
    %2 = vector.load %arg2[%c0_1, %c0_2] : memref<2x128xf32, #tpu.memory_space<vmem>>, vector<1x128xf32>
    %3 = vector.broadcast %1 : vector<8x1xf32> to vector<8x128xf32>
    %4 = vector.broadcast %2 : vector<1x128xf32> to vector<8x128xf32>
    %5 = arith.mulf %3, %4 : vector<8x128xf32>
    %6 = vector.extract_strided_slice %0 {offsets = [0, 1], sizes = [8, 1], strides = [1, 1]} : vector<8x2xf32> to vector<8x1xf32>
    %c1 = arith.constant 1 : index
    %c0_3 = arith.constant 0 : index
    %7 = vector.load %arg2[%c1, %c0_3] : memref<2x128xf32, #tpu.memory_space<vmem>>, vector<1x128xf32>
    %8 = vector.broadcast %6 : vector<8x1xf32> to vector<8x128xf32>
    %9 = vector.broadcast %7 : vector<1x128xf32> to vector<8x128xf32>
    %10 = arith.mulf %8, %9 : vector<8x128xf32>
    %11 = arith.addf %5, %10 : vector<8x128xf32>
    %c0_4 = arith.constant 0 : index
    %c0_5 = arith.constant 0 : index
    %12 = vector.load %arg3[%c0_4, %c0_5] : memref<1x128xf32, #tpu.memory_space<vmem>>, vector<1x128xf32>
    %13 = vector.broadcast %12 : vector<1x128xf32> to vector<8x128xf32>
    %14 = arith.addf %11, %13 : vector<8x128xf32>
    %cst = arith.constant 0.000000e+00 : f32
    %15 = vector.broadcast %cst : f32 to vector<8x128xf32>
    %16 = arith.maximumf %14, %15 : vector<8x128xf32>
    %c0_6 = arith.constant 0 : index
    %c0_7 = arith.constant 0 : index
    %17 = vector.load %arg4[%c0_6, %c0_7] : memref<128x128xf32, #tpu.memory_space<vmem>>, vector<128x128xf32>
    %cst_8 = arith.constant dense<0.000000e+00> : vector<8x128xf32>
    %18 = tpu.matmul %16, %17, %cst_8 {dimension_numbers = #tpu.dot_dimension_numbers<[1], [0], [0], [1], [0, 0, 1, 1], [], []>} : vector<8x128xf32>, vector<128x128xf32>, vector<8x128xf32> -> vector<8x128xf32>
    %c0_9 = arith.constant 0 : index
    %c0_10 = arith.constant 0 : index
    %19 = vector.load %arg5[%c0_9, %c0_10] : memref<1x128xf32, #tpu.memory_space<vmem>>, vector<1x128xf32>
    %20 = vector.broadcast %19 : vector<1x128xf32> to vector<8x128xf32>
    %21 = arith.addf %18, %20 : vector<8x128xf32>
    %cst_11 = arith.constant 0.000000e+00 : f32
    %22 = vector.broadcast %cst_11 : f32 to vector<8x128xf32>
    %23 = arith.maximumf %21, %22 : vector<8x128xf32>
    %c0_12 = arith.constant 0 : index
    %c0_13 = arith.constant 0 : index
    %24 = vector.load %arg6[%c0_12, %c0_13] : memref<128x128xf32, #tpu.memory_space<vmem>>, vector<128x128xf32>
    %cst_14 = arith.constant dense<0.000000e+00> : vector<8x128xf32>
    %25 = tpu.matmul %23, %24, %cst_14 {dimension_numbers = #tpu.dot_dimension_numbers<[1], [0], [0], [1], [0, 0, 1, 1], [], []>} : vector<8x128xf32>, vector<128x128xf32>, vector<8x128xf32> -> vector<8x128xf32>
    %c0_15 = arith.constant 0 : index
    %c0_16 = arith.constant 0 : index
    %26 = vector.load %arg7[%c0_15, %c0_16] : memref<1x128xf32, #tpu.memory_space<vmem>>, vector<1x128xf32>
    %27 = vector.broadcast %26 : vector<1x128xf32> to vector<8x128xf32>
    %28 = arith.addf %25, %27 : vector<8x128xf32>
    %c0_17 = arith.constant 0 : index
    %c0_18 = arith.constant 0 : index
    %29 = vector.load %arg8[%c0_17, %c0_18] : memref<8x128xf32, #tpu.memory_space<vmem>>, vector<8x128xf32>
    tpu.vector_store %arg8[%c0_17, %c0_18], %28 {strides = array<i32>} : memref<8x128xf32, #tpu.memory_space<vmem>>, vector<8x128xf32>,
    return
  }
  func.func @transform_0(%arg0: i32) -> (i32, i32) {
    %c0_i32 = arith.constant 0 : i32
    %c0_i32_0 = arith.constant 0 : i32
    return %arg0, %c0_i32 : i32, i32
  }
  func.func @transform_1(%arg0: i32) -> (i32, i32) {
    %c0_i32 = arith.constant 0 : i32
    %c0_i32_0 = arith.constant 0 : i32
    %c0_i32_1 = arith.constant 0 : i32
    return %c0_i32, %c0_i32_0 : i32, i32
  }
  func.func @transform_2(%arg0: i32) -> (i32, i32) {
    %c0_i32 = arith.constant 0 : i32
    %c0_i32_0 = arith.constant 0 : i32
    %c0_i32_1 = arith.constant 0 : i32
    return %c0_i32, %c0_i32_0 : i32, i32
  }
  func.func @transform_3(%arg0: i32) -> (i32, i32) {
    %c0_i32 = arith.constant 0 : i32
    %c0_i32_0 = arith.constant 0 : i32
    %c0_i32_1 = arith.constant 0 : i32
    return %c0_i32, %c0_i32_0 : i32, i32
  }
  func.func @transform_4(%arg0: i32) -> (i32, i32) {
    %c0_i32 = arith.constant 0 : i32
    %c0_i32_0 = arith.constant 0 : i32
    %c0_i32_1 = arith.constant 0 : i32
    return %c0_i32, %c0_i32_0 : i32, i32
  }
  func.func @transform_5(%arg0: i32) -> (i32, i32) {
    %c0_i32 = arith.constant 0 : i32
    %c0_i32_0 = arith.constant 0 : i32
    %c0_i32_1 = arith.constant 0 : i32
    return %c0_i32, %c0_i32_0 : i32, i32
  }
  func.func @transform_6(%arg0: i32) -> (i32, i32) {
    %c0_i32 = arith.constant 0 : i32
    %c0_i32_0 = arith.constant 0 : i32
    %c0_i32_1 = arith.constant 0 : i32
    return %c0_i32, %c0_i32_0 : i32, i32
  }
  func.func @transform_7(%arg0: i32) -> (i32, i32) {
    %c0_i32 = arith.constant 0 : i32
    %c0_i32_0 = arith.constant 0 : i32
    return %arg0, %c0_i32 : i32, i32
  }
}

</mosaic_0001>

<bundles_post_ra>
// kernel: mlp_forward.1
= control target key start
LH: loop header
LB: loop body
LE: loop exit
PB: predicated region body
PF: predicated region fallthrough
CT: control target
= control target key end

     0   :  { %v450_v3 = vmov 0   ;;  %v451_v4 = vmov 0.0|0.0   ;;  %s638_s0 = inlined_call_operand.vmem [shape: f32[8,2], index: 0, kind: input, shape index: {}]   ;;  %s639_s1 = inlined_call_operand.vmem [shape: f32[2,128], index: 1, kind: input, shape index: {}]   ;;  %s640_s2 = inlined_call_operand.vmem [shape: f32[1,128], index: 2, kind: input, shape index: {}]   ;;  %s641_s3 = inlined_call_operand.vmem [shape: f32[128,128], index: 3, kind: input, shape index: {}]   ;;  %s642_s4 = inlined_call_operand.vmem [shape: f32[1,128], index: 4, kind: input, shape index: {}]   ;;  %s643_s5 = inlined_call_operand.vmem [shape: f32[128,128], index: 5, kind: input, shape index: {}]   ;;  %s644_s6 = inlined_call_operand.vmem [shape: f32[1,128], index: 6, kind: input, shape index: {}]   ;;  %s645_s7 = inlined_call_operand.hbm [shape: f32[8,128], index: 7, kind: output, shape index: {}]  }
   0x1   :  { %v27_v0 = vld [vmem:[%s638_s0] sm:$0xff]  ;;  %v60_v2 = vld [vmem:[%s641_s3 + $0x8] sm:$0xff]  ;;  %424 = vset.pattern.permute.xlu0 %v450_v3  ;;  %370 = vmatprep.subr.bf16.mxu0 %v451_v4  ;;  %v61_v6 = vld [vmem:[%s641_s3 + $0x10] sm:$0xff] }
   0x2   :  { %v59_v1 = vld [vmem:[%s641_s3] sm:$0xff]  ;;  %v62_v7 = vld [vmem:[%s641_s3 + $0x18] sm:$0xff]  ;;  %31 = vperm.xlu0 %424, %v27_v0   ;;  %394 = vmatprep.subr.bf16.mxu1 %v451_v4  ;;  %v64_v10 = vld [vmem:[%s641_s3 + $0x28] sm:$0xff] }
   0x3   :  { %v371_v5 = vpack.c.bf16 %v60_v2, %v59_v1  ;;  %v374_v8 = vpack.c.bf16 %v62_v7, %v61_v6  ;;  %v63_v9 = vld [vmem:[%s641_s3 + $0x20] sm:$0xff] }
   0x5   :  { %372 = vmatpush3.bf16.msra.mxu0 %v371_v5 }
   0x6   :  { %373 = vmatprep.subr.bf16.mxu0 %v451_v4 }
   0x7   :  { %12 = vsyncpa [#allocation3], 0  ;;  %v452_v11 = vmov 1   ;;  %v377_v12 = vpack.c.bf16 %v64_v10, %v63_v9  ;;  %v65_v13 = vld [vmem:[%s641_s3 + $0x30] sm:$0xff]  ;;  %v66_v14 = vld [vmem:[%s641_s3 + $0x38] sm:$0xff]  ;;  %vm453_vm0 = vmmov 0  }
   0x8   :  { %425 = vset.pattern.permute.xlu0 %v452_v11  ;;  %v454_v15 = vmov 0.0   ;;  %v380_v16 = vpack.c.bf16 %v66_v14, %v65_v13  ;;  %v67_v17 = vld [vmem:[%s641_s3 + $0x40] sm:$0xff]  ;;  %v68_v18 = vld [vmem:[%s641_s3 + $0x48] sm:$0xff]  ;;  %v155_v22 = vld [vmem:[%s643_s5 + $0x10] sm:$0xff]  ;;  %s455_s25 = smov [#allocation2]  }
   0x9   :  { %41 = vperm.xlu0 %425, %v27_v0   ;;  %375 = vmatpush3.bf16.msra.mxu0 %v374_v8  ;;  %v383_v19 = vpack.c.bf16 %v68_v18, %v67_v17  ;;  %v153_v20 = vld [vmem:[%s643_s5] sm:$0xff]  ;;  %v154_v21 = vld [vmem:[%s643_s5 + $0x8] sm:$0xff]  ;;  %v69_v23 = vld [vmem:[%s641_s3 + $0x50] sm:$0xff]  ;;  %s253_s26 = sshll.u32 %s455_s25, 4  ;;  %s254_s26 = int_to_ptr.vmem [resolvable:$true] %s253_s26 }
   0xa   :  { %376 = vmatprep.subr.bf16.mxu0 %v451_v4  ;;  %332 = vmatprep.mubr.msk.f32.mxu0 %vm453_vm0, %v454_v15  ;;  %v70_v24 = vld [vmem:[%s641_s3 + $0x58] sm:$0xff]  ;;  %v395_v25 = vpack.c.bf16 %v154_v21, %v153_v20  ;;  %v157_v29 = vld [vmem:[%s643_s5 + $0x20] sm:$0xff]  ;;  %v158_v30 = vld [vmem:[%s643_s5 + $0x28] sm:$0xff]  ;;  %p431_p1 = scmp.lt.s32.totalorder %s254_s26, %s254_s26 }
   0xb   :  { %367 = vmatprep.mubr.msk.f32.mxu1 %vm453_vm0, %v454_v15  ;;  %v156_v26 = vld [vmem:[%s643_s5 + $0x18] sm:$0xff]  ;;  %v386_v28 = vpack.c.bf16 %v70_v24, %v69_v23  ;;  %v71_v31 = vld [vmem:[%s641_s3 + $0x60] sm:$0xff]  ;;  %v72_v32 = vld [vmem:[%s641_s3 + $0x68] sm:$0xff]  ;;  %v401_v33 = vpack.c.bf16 %v158_v30, %v157_v29 }
   0xc   :  { %396 = vmatpush3.bf16.msra.mxu1 %v395_v25  ;;  %v398_v27 = vpack.c.bf16 %v156_v26, %v155_v22  ;;  %v389_v34 = vpack.c.bf16 %v72_v32, %v71_v31  ;;  %v159_v35 = vld [vmem:[%s643_s5 + $0x30] sm:$0xff]  ;;  %v160_v36 = vld [vmem:[%s643_s5 + $0x38] sm:$0xff]  ;;  %v161_v41 = vld [vmem:[%s643_s5 + $0x40] sm:$0xff] }
   0xd   :  { %378 = vmatpush3.bf16.msra.mxu0 %v377_v12  ;;  %397 = vmatprep.subr.bf16.mxu1 %v451_v4  ;;  %v73_v37 = vld [vmem:[%s641_s3 + $0x70] sm:$0xff]  ;;  %v74_v38 = vld [vmem:[%s641_s3 + $0x78] sm:$0xff]  ;;  %v404_v39 = vpack.c.bf16 %v160_v36, %v159_v35  ;;  %v162_v42 = vld [vmem:[%s643_s5 + $0x48] sm:$0xff] }
   0xe   :  { %379 = vmatprep.subr.bf16.mxu0 %v451_v4  ;;  %v392_v40 = vpack.c.bf16 %v74_v38, %v73_v37  ;;  %v407_v43 = vpack.c.bf16 %v162_v42, %v161_v41  ;;  %v163_v44 = vld [vmem:[%s643_s5 + $0x50] sm:$0xff]  ;;  %v164_v45 = vld [vmem:[%s643_s5 + $0x58] sm:$0xff]  ;;  %v165_v47 = vld [vmem:[%s643_s5 + $0x60] sm:$0xff] }
   0xf   :  { %v410_v46 = vpack.c.bf16 %v164_v45, %v163_v44  ;;  %v166_v48 = vld [vmem:[%s643_s5 + $0x68] sm:$0xff]  ;;  %v261_v51 = vld [vmem:[%s639_s1] ss:$0 sm:$0xff]  ;;  %v262_v52 = vld [vmem:[%s639_s1 + $0x1] ss:$0 sm:$0xff] }
  0x10   :  { %399 = vmatpush3.bf16.msra.mxu1 %v398_v27  ;;  %v413_v49 = vpack.c.bf16 %v166_v48, %v165_v47  ;;  %v263_v56 = vld [vmem:[%s640_s2] ss:$0 sm:$0xff]  ;;  %v167_v60 = vld [vmem:[%s643_s5 + $0x70] sm:$0xff]  ;;  %v168_v61 = vld [vmem:[%s643_s5 + $0x78] sm:$0xff]  ;;  %s426_s5 = scalar_lea.vmem %s254_s26, 128 }
  0x11   :  { %381 = vmatpush3.bf16.msra.mxu0 %v380_v16  ;;  %400 = vmatprep.subr.bf16.mxu1 %v451_v4  ;;  %v416_v62 = vpack.c.bf16 %v168_v61, %v167_v60  ;;  %v264_v63 = vld [vmem:[%s642_s4] ss:$0 sm:$0xff]  ;;  %p427_p0 = scmp.ne.s32.totalorder %s254_s26, %s426_s5  ;;  %p432_p2 = scmp.lt.s32.totalorder %s426_s5, %s426_s5 }
  0x12   :  { %382 = vmatprep.subr.bf16.mxu0 %v451_v4 }
  0x13   :  { %p433_p3 = por %p432_p2, %p431_p1 }
  0x14   :  { %402 = vmatpush3.bf16.msra.mxu1 %v401_v33 }
  0x15   :  { %384 = vmatpush3.bf16.msra.mxu0 %v383_v19  ;;  %403 = vmatprep.subr.bf16.mxu1 %v451_v4  ;;  %p434_p4 = pnand %p433_p3, %p427_p0 }
  0x16   :  { %385 = vmatprep.subr.bf16.mxu0 %v451_v4 }
  0x18   :  { %405 = vmatpush3.bf16.msra.mxu1 %v404_v39 }
  0x19   :  { %387 = vmatpush3.bf16.msra.mxu0 %v386_v28  ;;  %406 = vmatprep.subr.bf16.mxu1 %v451_v4 }
  0x1a   :  { %388 = vmatprep.subr.bf16.mxu0 %v451_v4 }
  0x1c   :  { %408 = vmatpush3.bf16.msra.mxu1 %v407_v43 }
  0x1d   :  { %390 = vmatpush3.bf16.msra.mxu0 %v389_v34  ;;  %409 = vmatprep.subr.bf16.mxu1 %v451_v4 }
  0x1e   :  { %391 = vmatprep.subr.bf16.mxu0 %v451_v4 }
  0x20   :  { %411 = vmatpush3.bf16.msra.mxu1 %v410_v46 }
  0x21   :  { %393 = vmatpush3.bf16.msra.mxu0 %v392_v40  ;;  %412 = vmatprep.subr.bf16.mxu1 %v451_v4 }
  0x24   :  { %414 = vmatpush3.bf16.msra.mxu1 %v413_v49 }
  0x25   :  { %415 = vmatprep.subr.bf16.mxu1 %v451_v4  ;;  %v265_v4 = vld [vmem:[%s644_s6] ss:$0 sm:$0xff] }
  0x28   :  { %417 = vmatpush3.bf16.msra.mxu1 %v416_v62 }
  0x81   :  { %v32_v50 = vpop.permute.xlu0 %31 }
  0x82   :  { %v38_v54 = vmul.f32 %v261_v51, %v32_v50 }
  0x88   :  { %v42_v53 = vpop.permute.xlu0 %41 }
  0x89   :  { %v48_v55 = vmul.f32 %v262_v52, %v42_v53 }
  0x8b   :  { %v49_v57 = vadd.f32 %v48_v55, %v38_v54 }
  0x8d   :  { %v57_v58 = vadd.f32 %v263_v56, %v49_v57 }
  0x8f   :  { %v58_v59 = vmax.f32 %v57_v58, 0.0 }
  0x91   :  { %333 = vmatmul.mubr.f32.vlgmr.msra.gmra.mrb[0].mxu0 %v58_v59 }
 0x164   :  { %v148_v0 = vpop.f32.mrb[0].mxu0 }
 0x165   :  { %v149_v1 = vadd.f32 %v264_v63, %v148_v0  ;;  %v334_v2 = vpop.f32.mrb[1].mxu0 }
 0x167   :  { %v152_v3 = vmax.f32 %v149_v1, 0.0 }
 0x169   :  { %368 = vmatmul.mubr.f32.vlgmr.msra.gmra.mrb[0].mxu1 %v152_v3 }
 0x23c   :  { %v242_v5 = vpop.f32.mrb[0].mxu1 }
 0x23d   :  { %v243_v6 = vadd.f32 %v265_v4, %v242_v5  ;;  %v369_v7 = vpop.f32.mrb[1].mxu1 }
 0x23f   :  { %246 = vst [vmem:[#allocation2] sm:$0xff] %v243_v6 }
 0x240   :  { %437 = shalt.err (!%p434_p4)
}
 0x241   :  { %s438_s28 = scalar_lea.hbm %s645_s7, 128 }
 0x242   :  { %p439_p5 = scmp.ne.s32.totalorder %s645_s7, %s438_s28  ;;  %p442_p6 = scmp.lt.u32.totalorder %s438_s28, %s645_s7 }
 0x244   :  { %p444_p7 = pnand %p442_p6, %p439_p5 }
 0x246   :  { %447 = shalt.err (!%p444_p7)
}
 0x247   :  { %256 = dma.vmem_to_hbm [thread:$0]  %s254_s26, 128, %s645_s7, [#allocation3]  }
 0x248   :  { %448 = dma.done.wait [#allocation3], 128  }
 0x249   :  { %449 = vsyncadd [#allocation3], 4294967168 }
 0x24a   :  { %260 = vsyncpa [#allocation3], 1 }

</bundles_post_ra>
